<compile_context>
chip_gen: v7x
topology: tpu7x:2x2x1
jax: 0.10.0
libtpu: 0.0.40
codegen_flags: <defaults>
</compile_context>

<pallas_src>
import jax
import jax.numpy as jnp
from jax.experimental import pallas as pl
from jax.experimental.pallas import tpu as pltpu


def _round_up(n, m):
    return ((n + m - 1) // m) * m


def _num_tensorcores():
    """Best-effort TensorCore count (v7x: 2/chip, v5e/v6e: 1). Defaults to 1."""
    try:
        info = pltpu.get_tpu_info()
        for attr in ("num_cores", "num_tensorcores", "tensorcore_count", "core_count"):
            v = getattr(info, attr, None)
            if isinstance(v, int) and v > 0:
                return v
    except Exception:
        pass
    return 1


def _direct_ranker_kernel(x_ref, w0_ref, b0_ref, w1_ref, b1_ref, wout_ref, out_ref):
    """One row tile of the lane-packed batch.

    x_ref:    (tr, P*D)   -- P samples packed per 128-lane row.
    w0_ref:   (P*D, P*H)  -- block-diagonal copies of w0.
    b0_ref:   (1, P*H)
    w1_ref:   (P*H, P*H)  -- block-diagonal copies of w1.
    b1_ref:   (1, P*H)
    wout_ref: (P*H, P)    -- block-diagonal bias-free head.
    out_ref:  (tr, P)     -- score of sample (row * P + lane).
    """
    h = jnp.dot(x_ref[...], w0_ref[...], preferred_element_type=jnp.float32) + b0_ref[...]
    h = jnp.maximum(h, 0.0)
    h = jnp.dot(h, w1_ref[...], preferred_element_type=jnp.float32) + b1_ref[...]
    h = jnp.maximum(h, 0.0)
    out_ref[...] = jnp.dot(h, wout_ref[...], preferred_element_type=jnp.float32)


def _pack_params(params, P):
    """Build block-diagonal weights packing P samples per 128-lane row."""
    w0 = params["w0"]
    b0 = params["b0"].reshape(1, -1)
    w1 = params["w1"]
    b1 = params["b1"].reshape(1, -1)
    wout = params["w_out"]
    if P == 1:
        return w0, b0, w1, b1, wout
    eye = jnp.eye(P, dtype=w0.dtype)
    w0_bd = jnp.kron(eye, w0)          # (P*D, P*H)
    w1_bd = jnp.kron(eye, w1)          # (P*H, P*H)
    wout_bd = jnp.kron(eye, wout)      # (P*H, P)
    b0_bd = jnp.tile(b0, (1, P))       # (1, P*H)
    b1_bd = jnp.tile(b1, (1, P))       # (1, P*H)
    return w0_bd, b0_bd, w1_bd, b1_bd, wout_bd


def direct_ranker(x, params, *, tr=None):
    """x: (B, 2, D) float32. Returns (out_diff, out_x1, out_x2), each (B, 1)."""
    B, N, D = x.shape
    assert N == 2
    H = params["w0"].shape[1]

    # Lane pack factor: P samples per 128-lane vreg row (4 when D=H=32).
    P = max(1, 128 // max(D, H))
    PD, PH = P * D, P * H

    w0_bd, b0_bd, w1_bd, b1_bd, wout_bd = _pack_params(params, P)

    rows = 2 * B
    xf = x.reshape(rows, D)                       # free reshape (contiguous rows)
    packed_rows = pl.cdiv(rows, P)

    # Tile selection (packed rows). Big tiles amortize the ~0.35us/step pipeline
    # overhead; only force a balanced multi-step split when >1 TensorCore exists.
    n_cores = _num_tensorcores()
    if tr is None:
        tr = min(2048, _round_up(packed_rows, 8))
        if n_cores > 1 and packed_rows > 8 * n_cores:
            steps = n_cores * pl.cdiv(packed_rows, tr * n_cores)
            tr = max(8, _round_up(pl.cdiv(packed_rows, steps), 8))
    tr = _round_up(tr, 8)

    grid_r = pl.cdiv(packed_rows, tr)
    rows_pad = grid_r * tr * P
    if rows_pad != rows:
        # Tail handled by zero-padding; padded scores are sliced off below.
        xf = jnp.pad(xf, ((0, rows_pad - rows), (0, 0)))
    xp = xf.reshape(rows_pad // P, PD)            # lane-packed input

    rep = lambda shape: pl.BlockSpec(shape, lambda i: (0, 0))  # VMEM-resident consts

    grid_spec = pltpu.PrefetchScalarGridSpec(
        num_scalar_prefetch=0,
        grid=(grid_r,),
        in_specs=[
            pl.BlockSpec((tr, PD), lambda i: (i, 0)),   # packed x
            rep((PD, PH)),                              # w0 block-diag
            rep((1, PH)),                               # b0
            rep((PH, PH)),                              # w1 block-diag
            rep((1, PH)),                               # b1
            rep((PH, P)),                               # head block-diag
        ],
        out_specs=pl.BlockSpec((tr, P), lambda i: (i, 0)),
    )

    out = pl.pallas_call(
        _direct_ranker_kernel,
        out_shape=jax.ShapeDtypeStruct((rows_pad // P, P), jnp.float32),
        grid_spec=grid_spec,
        compiler_params=pltpu.CompilerParams(
            dimension_semantics=("parallel",),
            vmem_limit_bytes=32 * 1024 * 1024,
        ),
    )(xp, w0_bd, b0_bd, w1_bd, b1_bd, wout_bd)

    # out[r, j] is the score of flat sample r*P + j; flat sample 2*b + m is pair
    # member m of batch b.  Diff + 3-way split are trivial wrapper ops.
    scores = out.reshape(rows_pad)[:rows].reshape(B, 2)
    o1 = scores[:, 0:1]
    o2 = scores[:, 1:2]
    return o1 - o2, o1, o2


def _reference(x, params):
    """Pure-JAX reference matching the PyTorch forward semantics."""
    x1 = x[:, 0, :]
    x2 = x[:, 1, :]

    def enc(z):
        z = jnp.maximum(z @ params["w0"] + params["b0"], 0.0)
        z = jnp.maximum(z @ params["w1"] + params["b1"], 0.0)
        return z

    e1, e2 = enc(x1), enc(x2)
    head = lambda z: z @ params["w_out"]
    return head(e1 - e2), head(e1), head(e2)


def _init_params(key, in_dim, hidden_dim):
    # Deterministic xavier-uniform-style init (matches xavier_init=True in spirit).
    k0, k1, k2 = jax.random.split(key, 3)

    def xavier(k, fan_in, fan_out):
        lim = jnp.sqrt(6.0 / (fan_in + fan_out))
        return jax.random.uniform(k, (fan_in, fan_out), jnp.float32, -lim, lim)

    return {
        "w0": xavier(k0, in_dim, hidden_dim),
        "b0": jnp.zeros((1, hidden_dim), jnp.float32),
        "w1": xavier(k1, hidden_dim, hidden_dim),
        "b1": jnp.zeros((1, hidden_dim), jnp.float32),
        "w_out": xavier(k2, hidden_dim, 1),   # bias=False in out_ffnn
    }


if __name__ == "__main__":
    # Small config: in_dim=32, hidden_dim=32, mlp_layers=2, ReLU activation,
    # dropout inactive (eval mode).
    B, IN_DIM, HIDDEN = 16, 32, 32

    key = jax.random.PRNGKey(0)
    kx, kp = jax.random.split(key)
    x = jax.random.normal(kx, (B, 2, IN_DIM), jnp.float32)
    params = _init_params(kp, IN_DIM, HIDDEN)

    out_diff, out_x1, out_x2 = direct_ranker(x, params)
    jax.block_until_ready((out_diff, out_x1, out_x2))

    ref_diff, ref_x1, ref_x2 = _reference(x, params)
    assert out_diff.shape == (B, 1) and out_x1.shape == (B, 1) and out_x2.shape == (B, 1)
    assert jnp.allclose(out_diff, ref_diff, atol=1e-4)
    assert jnp.allclose(out_x1, ref_x1, atol=1e-4)
    assert jnp.allclose(out_x2, ref_x2, atol=1e-4)

    # Also exercise a batch that is NOT divisible by the pack factor / tile.
    B2 = 13
    x2_in = jax.random.normal(jax.random.PRNGKey(1), (B2, 2, IN_DIM), jnp.float32)
    d2, a2, b2 = direct_ranker(x2_in, params)
    jax.block_until_ready((d2, a2, b2))
    rd2, ra2, rb2 = _reference(x2_in, params)
    assert d2.shape == (B2, 1)
    assert jnp.allclose(d2, rd2, atol=1e-4)
    assert jnp.allclose(a2, ra2, atol=1e-4)
    assert jnp.allclose(b2, rb2, atol=1e-4)

    print("KERNEL_OK")
</pallas_src>

<mosaic_0001>
module attributes {stable_mosaic.version = 11 : i64} {
  func.func @_direct_ranker_kernel(%arg0: i32, %arg1: memref<8x128xf32, #tpu.memory_space<vmem>>, %arg2: memref<128x128xf32, #tpu.memory_space<vmem>>, %arg3: memref<1x128xf32, #tpu.memory_space<vmem>>, %arg4: memref<128x128xf32, #tpu.memory_space<vmem>>, %arg5: memref<1x128xf32, #tpu.memory_space<vmem>>, %arg6: memref<128x4xf32, #tpu.memory_space<vmem>>, %arg7: memref<8x4xf32, #tpu.memory_space<vmem>>) attributes {dimension_semantics = [#tpu.dimension_semantics<parallel>], iteration_bounds = array<i64: 1>, scalar_prefetch = 0 : i64, scratch_operands = 0 : i64, tpu.core_type = #tpu.core_type<tc>, window_params = [{transform_indices = @transform_0, window_bounds = array<i64: 8, 128>}, {pipeline_mode = #tpu.pipeline_mode<synchronous>, transform_indices = @transform_1, window_bounds = array<i64: 128, 128>}, {pipeline_mode = #tpu.pipeline_mode<synchronous>, transform_indices = @transform_2, window_bounds = array<i64: 1, 128>}, {pipeline_mode = #tpu.pipeline_mode<synchronous>, transform_indices = @transform_3, window_bounds = array<i64: 128, 128>}, {pipeline_mode = #tpu.pipeline_mode<synchronous>, transform_indices = @transform_4, window_bounds = array<i64: 1, 128>}, {pipeline_mode = #tpu.pipeline_mode<synchronous>, transform_indices = @transform_5, window_bounds = array<i64: 128, 4>}, {transform_indices = @transform_6, window_bounds = array<i64: 8, 4>}]} {
    %c0 = arith.constant 0 : index
    %c0_0 = arith.constant 0 : index
    %0 = vector.load %arg1[%c0, %c0_0] : memref<8x128xf32, #tpu.memory_space<vmem>>, vector<8x128xf32>
    %c0_1 = arith.constant 0 : index
    %c0_2 = arith.constant 0 : index
    %1 = vector.load %arg2[%c0_1, %c0_2] : memref<128x128xf32, #tpu.memory_space<vmem>>, vector<128x128xf32>
    %cst = arith.constant dense<0.000000e+00> : vector<8x128xf32>
    %2 = tpu.matmul %0, %1, %cst {dimension_numbers = #tpu.dot_dimension_numbers<[1], [0], [0], [1], [0, 0, 1, 1], [], []>} : vector<8x128xf32>, vector<128x128xf32>, vector<8x128xf32> -> vector<8x128xf32>
    %c0_3 = arith.constant 0 : index
    %c0_4 = arith.constant 0 : index
    %3 = vector.load %arg3[%c0_3, %c0_4] : memref<1x128xf32, #tpu.memory_space<vmem>>, vector<1x128xf32>
    %4 = vector.broadcast %3 : vector<1x128xf32> to vector<8x128xf32>
    %5 = arith.addf %2, %4 : vector<8x128xf32>
    %cst_5 = arith.constant 0.000000e+00 : f32
    %6 = vector.broadcast %cst_5 : f32 to vector<8x128xf32>
    %7 = arith.maximumf %5, %6 : vector<8x128xf32>
    %c0_6 = arith.constant 0 : index
    %c0_7 = arith.constant 0 : index
    %8 = vector.load %arg4[%c0_6, %c0_7] : memref<128x128xf32, #tpu.memory_space<vmem>>, vector<128x128xf32>
    %cst_8 = arith.constant dense<0.000000e+00> : vector<8x128xf32>
    %9 = tpu.matmul %7, %8, %cst_8 {dimension_numbers = #tpu.dot_dimension_numbers<[1], [0], [0], [1], [0, 0, 1, 1], [], []>} : vector<8x128xf32>, vector<128x128xf32>, vector<8x128xf32> -> vector<8x128xf32>
    %c0_9 = arith.constant 0 : index
    %c0_10 = arith.constant 0 : index
    %10 = vector.load %arg5[%c0_9, %c0_10] : memref<1x128xf32, #tpu.memory_space<vmem>>, vector<1x128xf32>
    %11 = vector.broadcast %10 : vector<1x128xf32> to vector<8x128xf32>
    %12 = arith.addf %9, %11 : vector<8x128xf32>
    %cst_11 = arith.constant 0.000000e+00 : f32
    %13 = vector.broadcast %cst_11 : f32 to vector<8x128xf32>
    %14 = arith.maximumf %12, %13 : vector<8x128xf32>
    %c0_12 = arith.constant 0 : index
    %c0_13 = arith.constant 0 : index
    %15 = vector.load %arg6[%c0_12, %c0_13] : memref<128x4xf32, #tpu.memory_space<vmem>>, vector<128x4xf32>
    %cst_14 = arith.constant dense<0.000000e+00> : vector<8x4xf32>
    %16 = tpu.matmul %14, %15, %cst_14 {dimension_numbers = #tpu.dot_dimension_numbers<[1], [0], [0], [1], [0, 0, 1, 1], [], []>} : vector<8x128xf32>, vector<128x4xf32>, vector<8x4xf32> -> vector<8x4xf32>
    %c0_15 = arith.constant 0 : index
    %c0_16 = arith.constant 0 : index
    %17 = vector.load %arg7[%c0_15, %c0_16] : memref<8x4xf32, #tpu.memory_space<vmem>>, vector<8x4xf32>
    tpu.vector_store %arg7[%c0_15, %c0_16], %16 {strides = array<i32>} : memref<8x4xf32, #tpu.memory_space<vmem>>, vector<8x4xf32>,
    return
  }
  func.func @transform_0(%arg0: i32) -> (i32, i32) {
    %c0_i32 = arith.constant 0 : i32
    %c0_i32_0 = arith.constant 0 : i32
    return %arg0, %c0_i32 : i32, i32
  }
  func.func @transform_1(%arg0: i32) -> (i32, i32) {
    %c0_i32 = arith.constant 0 : i32
    %c0_i32_0 = arith.constant 0 : i32
    %c0_i32_1 = arith.constant 0 : i32
    return %c0_i32, %c0_i32_0 : i32, i32
  }
  func.func @transform_2(%arg0: i32) -> (i32, i32) {
    %c0_i32 = arith.constant 0 : i32
    %c0_i32_0 = arith.constant 0 : i32
    %c0_i32_1 = arith.constant 0 : i32
    return %c0_i32, %c0_i32_0 : i32, i32
  }
  func.func @transform_3(%arg0: i32) -> (i32, i32) {
    %c0_i32 = arith.constant 0 : i32
    %c0_i32_0 = arith.constant 0 : i32
    %c0_i32_1 = arith.constant 0 : i32
    return %c0_i32, %c0_i32_0 : i32, i32
  }
  func.func @transform_4(%arg0: i32) -> (i32, i32) {
    %c0_i32 = arith.constant 0 : i32
    %c0_i32_0 = arith.constant 0 : i32
    %c0_i32_1 = arith.constant 0 : i32
    return %c0_i32, %c0_i32_0 : i32, i32
  }
  func.func @transform_5(%arg0: i32) -> (i32, i32) {
    %c0_i32 = arith.constant 0 : i32
    %c0_i32_0 = arith.constant 0 : i32
    %c0_i32_1 = arith.constant 0 : i32
    return %c0_i32, %c0_i32_0 : i32, i32
  }
  func.func @transform_6(%arg0: i32) -> (i32, i32) {
    %c0_i32 = arith.constant 0 : i32
    %c0_i32_0 = arith.constant 0 : i32
    return %arg0, %c0_i32 : i32, i32
  }
}

</mosaic_0001>

<bundles_post_ra>
// kernel: tpu_custom_call.1
= control target key start
LH: loop header
LB: loop body
LE: loop exit
PB: predicated region body
PF: predicated region fallthrough
CT: control target
= control target key end

     0   :  { %11 = vsyncpa [#allocation3], 0  ;;  %s825_s0 = inlined_call_operand.hbm [shape: f32[8,128], index: 0, kind: input, shape index: {}]   ;;  %s826_s1 = inlined_call_operand.vmem [shape: f32[128,128], index: 1, kind: input, shape index: {}]   ;;  %s827_s2 = inlined_call_operand.vmem [shape: f32[1,128], index: 2, kind: input, shape index: {}]   ;;  %s828_s3 = inlined_call_operand.hbm [shape: f32[128,128], index: 3, kind: input, shape index: {}]   ;;  %s829_s4 = inlined_call_operand.vmem [shape: f32[1,128], index: 4, kind: input, shape index: {}]   ;;  %s830_s5 = inlined_call_operand.vmem [shape: f32[128,4], index: 5, kind: input, shape index: {}]   ;;  %s831_s6 = inlined_call_operand.vmem [shape: f32[8,4], index: 6, kind: output, shape index: {}]  }
   0x1   :  { %12 = vsyncpa [#allocation5], 0  ;;  %s617_s21 = smov [#allocation2]   ;;  %s618_s23 = smov [#allocation4]  }
   0x2   :  { %s19_s22 = sshll.u32 %s617_s21, 4  ;;  %s32_s24 = sshll.u32 %s618_s23, 4  ;;  %s20_s22 = int_to_ptr.vmem [resolvable:$true] %s19_s22  ;;  %s659_s24 = int_to_ptr.vmem [resolvable:$true] %s32_s24 }
   0x3   :  { %s569_s27 = scalar_lea.hbm %s825_s0, 128 }
   0x4   :  { %p570_p0 = scmp.ne.s32.totalorder %s825_s0, %s569_s27  ;;  %p573_p1 = scmp.lt.u32.totalorder %s569_s27, %s825_s0 }
   0x6   :  { %p575_p2 = pnand %p573_p1, %p570_p0 }
   0x8   :  { %578 = shalt.err (!%p575_p2)
}
   0x9   :  { %s579_s8 = scalar_lea.vmem %s20_s22, 128  ;;  %p584_p4 = scmp.lt.s32.totalorder %s20_s22, %s20_s22 }
   0xa   :  { %p580_p3 = scmp.ne.s32.totalorder %s20_s22, %s579_s8  ;;  %p585_p5 = scmp.lt.s32.totalorder %s579_s8, %s579_s8 }
   0xc   :  { %p586_p6 = por %p585_p5, %p584_p4 }
   0xe   :  { %p587_p7 = pnand %p586_p6, %p580_p3 }
  0x10   :  { %590 = shalt.err (!%p587_p7)
}
  0x11   :  { %22 = dma.hbm_to_vmem [thread:$0]  %s825_s0, 128, %s20_s22, [#allocation3]  }
  0x12   :  { %s591_s13 = scalar_lea.hbm %s828_s3, 2048 }
  0x13   :  { %p592_p8 = scmp.ne.s32.totalorder %s828_s3, %s591_s13  ;;  %p595_p9 = scmp.lt.u32.totalorder %s591_s13, %s828_s3 }
  0x15   :  { %p597_p10 = pnand %p595_p9, %p592_p8 }
  0x17   :  { %600 = shalt.err (!%p597_p10)
}
  0x18   :  { %s601_s18 = scalar_lea.vmem %s659_s24, 2048  ;;  %p606_p12 = scmp.lt.s32.totalorder %s659_s24, %s659_s24 }
  0x19   :  { %p602_p11 = scmp.ne.s32.totalorder %s659_s24, %s601_s18  ;;  %p607_p13 = scmp.lt.s32.totalorder %s601_s18, %s601_s18 }
  0x1b   :  { %p608_p0 = por %p607_p13, %p606_p12 }
  0x1d   :  { %p609_p1 = pnand %p608_p0, %p602_p11 }
  0x1f   :  { %612 = shalt.err (!%p609_p1)
}
  0x20   :  { %s619_s0 = smov 128   ;;  %s620_s19 = smov 8  }
  0x21   :  { %38 = dma.hbm_to_vmem [thread:$0]  %s828_s3, 2048, %s659_s24, [#allocation5], %s619_s0, %s619_s0, %s620_s19  }
  0x22   :  { %613 = dma.done.wait [#allocation3], 128  }
  0x23   :  { %614 = vsyncadd [#allocation3], 4294967168 }
  0x24   :  { %615 = dma.done.wait [#allocation5], 2048  }
  0x25   :  { %616 = vsyncadd [#allocation5], 4294965248  ;;  %v621_v0 = vmov 0.0|0.0   ;;  %vm622_vm0 = vmmov 0   ;;  %v623_v1 = vmov 0.0   ;;  %v50_v2 = vld [vmem:[%s826_s1] sm:$0xff] }
  0x26   :  { %490 = vmatprep.subr.bf16.mxu0 %v621_v0  ;;  %417 = vmatprep.mubr.msk.f32.mxu0 %vm622_vm0, %v623_v1  ;;  %v51_v3 = vld [vmem:[%s826_s1 + $0x8] sm:$0xff]  ;;  %v52_v4 = vld [vmem:[%s826_s1 + $0x10] sm:$0xff]  ;;  %v53_v6 = vld [vmem:[%s826_s1 + $0x18] sm:$0xff]  ;;  %vm324_vm1 = vcmask 31744  }
  0x27   :  { %514 = vmatprep.subr.bf16.mxu1 %v621_v0  ;;  %452 = vmatprep.mubr.msk.f32.mxu1 %vm622_vm0, %v623_v1  ;;  %v491_v5 = vpack.c.bf16 %v51_v3, %v50_v2  ;;  %v494_v7 = vpack.c.bf16 %v53_v6, %v52_v4  ;;  %v54_v8 = vld [vmem:[%s826_s1 + $0x20] sm:$0xff]  ;;  %v55_v9 = vld [vmem:[%s826_s1 + $0x28] sm:$0xff]  ;;  %v145_v11 = vld [vmem:[#allocation4 + $0x8] sm:$0xff] }
  0x28   :  { %v144_v10 = vld [vmem:[#allocation4] sm:$0xff]  ;;  %v146_v12 = vld [vmem:[#allocation4 + $0x10] sm:$0xff]  ;;  %v147_v13 = vld [vmem:[#allocation4 + $0x18] sm:$0xff]  ;;  %v497_v14 = vpack.c.bf16 %v55_v9, %v54_v8 }
  0x29   :  { %492 = vmatpush3.bf16.msra.mxu0 %v491_v5  ;;  %v515_v15 = vpack.c.bf16 %v145_v11, %v144_v10  ;;  %v56_v16 = vld [vmem:[%s826_s1 + $0x30] sm:$0xff]  ;;  %v57_v17 = vld [vmem:[%s826_s1 + $0x38] sm:$0xff]  ;;  %v518_v18 = vpack.c.bf16 %v147_v13, %v146_v12  ;;  %v148_v19 = vld [vmem:[#allocation4 + $0x20] sm:$0xff] }
  0x2a   :  { %493 = vmatprep.subr.bf16.mxu0 %v621_v0  ;;  %v149_v20 = vld [vmem:[#allocation4 + $0x28] sm:$0xff]  ;;  %v500_v21 = vpack.c.bf16 %v57_v17, %v56_v16  ;;  %v58_v22 = vld [vmem:[%s826_s1 + $0x40] sm:$0xff]  ;;  %v59_v23 = vld [vmem:[%s826_s1 + $0x48] sm:$0xff] }
  0x2b   :  { %516 = vmatpush3.bf16.msra.mxu1 %v515_v15  ;;  %v521_v24 = vpack.c.bf16 %v149_v20, %v148_v19  ;;  %v150_v25 = vld [vmem:[#allocation4 + $0x30] sm:$0xff]  ;;  %v151_v26 = vld [vmem:[#allocation4 + $0x38] sm:$0xff]  ;;  %v503_v27 = vpack.c.bf16 %v59_v23, %v58_v22  ;;  %v60_v28 = vld [vmem:[%s826_s1 + $0x50] sm:$0xff] }
  0x2c   :  { %517 = vmatprep.subr.bf16.mxu1 %v621_v0  ;;  %v61_v29 = vld [vmem:[%s826_s1 + $0x58] sm:$0xff]  ;;  %v524_v30 = vpack.c.bf16 %v151_v26, %v150_v25  ;;  %v152_v31 = vld [vmem:[#allocation4 + $0x40] sm:$0xff]  ;;  %v153_v32 = vld [vmem:[#allocation4 + $0x48] sm:$0xff] }
  0x2d   :  { %495 = vmatpush3.bf16.msra.mxu0 %v494_v7  ;;  %v506_v33 = vpack.c.bf16 %v61_v29, %v60_v28  ;;  %v62_v34 = vld [vmem:[%s826_s1 + $0x60] sm:$0xff]  ;;  %v63_v35 = vld [vmem:[%s826_s1 + $0x68] sm:$0xff]  ;;  %v527_v36 = vpack.c.bf16 %v153_v32, %v152_v31  ;;  %v154_v37 = vld [vmem:[#allocation4 + $0x50] sm:$0xff] }
  0x2e   :  { %496 = vmatprep.subr.bf16.mxu0 %v621_v0  ;;  %v155_v38 = vld [vmem:[#allocation4 + $0x58] sm:$0xff]  ;;  %v509_v39 = vpack.c.bf16 %v63_v35, %v62_v34  ;;  %v64_v40 = vld [vmem:[%s826_s1 + $0x70] sm:$0xff]  ;;  %v65_v41 = vld [vmem:[%s826_s1 + $0x78] sm:$0xff] }
  0x2f   :  { %519 = vmatpush3.bf16.msra.mxu1 %v518_v18  ;;  %v530_v42 = vpack.c.bf16 %v155_v38, %v154_v37  ;;  %v156_v43 = vld [vmem:[#allocation4 + $0x60] sm:$0xff]  ;;  %v157_v44 = vld [vmem:[#allocation4 + $0x68] sm:$0xff]  ;;  %v512_v45 = vpack.c.bf16 %v65_v41, %v64_v40  ;;  %v49_v47 = vld [vmem:[#allocation2] sm:$0xff] }
  0x30   :  { %520 = vmatprep.subr.bf16.mxu1 %v621_v0  ;;  %v533_v46 = vpack.c.bf16 %v157_v44, %v156_v43  ;;  %v158_v48 = vld [vmem:[#allocation4 + $0x70] sm:$0xff]  ;;  %v159_v49 = vld [vmem:[#allocation4 + $0x78] sm:$0xff]  ;;  %v239_v52 = vld [vmem:[%s830_s5 + $0x8] sm:$0xff] }
  0x31   :  { %498 = vmatpush3.bf16.msra.mxu0 %v497_v14  ;;  %v536_v50 = vpack.c.bf16 %v159_v49, %v158_v48  ;;  %v238_v51 = vld [vmem:[%s830_s5] sm:$0xff]  ;;  %v240_v53 = vld [vmem:[%s830_s5 + $0x10] sm:$0xff]  ;;  %v241_v55 = vld [vmem:[%s830_s5 + $0x18] sm:$0xff] }
  0x32   :  { %499 = vmatprep.subr.bf16.mxu0 %v621_v0  ;;  %v539_v54 = vpack.c.bf16 %v239_v52, %v238_v51  ;;  %v542_v56 = vpack.c.bf16 %v241_v55, %v240_v53  ;;  %v242_v57 = vld [vmem:[%s830_s5 + $0x20] sm:$0xff]  ;;  %v243_v58 = vld [vmem:[%s830_s5 + $0x28] sm:$0xff]  ;;  %v244_v60 = vld [vmem:[%s830_s5 + $0x30] sm:$0xff] }
  0x33   :  { %522 = vmatpush3.bf16.msra.mxu1 %v521_v24  ;;  %v545_v59 = vpack.c.bf16 %v243_v58, %v242_v57  ;;  %v245_v61 = vld [vmem:[%s830_s5 + $0x38] sm:$0xff]  ;;  %v246_v63 = vld [vmem:[%s830_s5 + $0x40] sm:$0xff]  ;;  %v248_v3 = vld [vmem:[%s830_s5 + $0x50] sm:$0xff] }
  0x34   :  { %523 = vmatprep.subr.bf16.mxu1 %v621_v0  ;;  %v548_v62 = vpack.c.bf16 %v245_v61, %v244_v60  ;;  %v249_v4 = vld [vmem:[%s830_s5 + $0x58] sm:$0xff]  ;;  %v250_v6 = vld [vmem:[%s830_s5 + $0x60] sm:$0xff]  ;;  %v251_v7 = vld [vmem:[%s830_s5 + $0x68] sm:$0xff] }
  0x35   :  { %501 = vmatpush3.bf16.msra.mxu0 %v500_v21  ;;  %v554_v5 = vpack.c.bf16 %v249_v4, %v248_v3  ;;  %v557_v8 = vpack.c.bf16 %v251_v7, %v250_v6  ;;  %v332_v9 = vld [vmem:[%s827_s2] ss:$0 sm:$0xff]  ;;  %v252_v14 = vld [vmem:[%s830_s5 + $0x70] sm:$0xff]  ;;  %v253_v15 = vld [vmem:[%s830_s5 + $0x78] sm:$0xff] }
  0x36   :  { %502 = vmatprep.subr.bf16.mxu0 %v621_v0  ;;  %v560_v16 = vpack.c.bf16 %v253_v15, %v252_v14 }
  0x37   :  { %525 = vmatpush3.bf16.msra.mxu1 %v524_v30 }
  0x38   :  { %526 = vmatprep.subr.bf16.mxu1 %v621_v0 }
  0x39   :  { %504 = vmatpush3.bf16.msra.mxu0 %v503_v27 }
  0x3a   :  { %505 = vmatprep.subr.bf16.mxu0 %v621_v0 }
  0x3b   :  { %528 = vmatpush3.bf16.msra.mxu1 %v527_v36 }
  0x3c   :  { %529 = vmatprep.subr.bf16.mxu1 %v621_v0 }
  0x3d   :  { %507 = vmatpush3.bf16.msra.mxu0 %v506_v33 }
  0x3e   :  { %508 = vmatprep.subr.bf16.mxu0 %v621_v0 }
  0x3f   :  { %531 = vmatpush3.bf16.msra.mxu1 %v530_v42 }
  0x40   :  { %532 = vmatprep.subr.bf16.mxu1 %v621_v0 }
  0x41   :  { %510 = vmatpush3.bf16.msra.mxu0 %v509_v39 }
  0x42   :  { %511 = vmatprep.subr.bf16.mxu0 %v621_v0 }
  0x43   :  { %534 = vmatpush3.bf16.msra.mxu1 %v533_v46 }
  0x44   :  { %535 = vmatprep.subr.bf16.mxu1 %v621_v0 }
  0x45   :  { %513 = vmatpush3.bf16.msra.mxu0 %v512_v45 }
  0x46   :  { %538 = vmatprep.subr.bf16.mxu0 %v621_v0 }
  0x47   :  { %537 = vmatpush3.bf16.msra.mxu1 %v536_v50 }
  0x48   :  { %418 = vmatmul.mubr.f32.vlgmr.msra.gmra.mrb[0].mxu0 %v49_v47 }
  0x49   :  { %487 = vmatprep.mubr.msk.f32.mxu0 %vm622_vm0, %v623_v1  ;;  %540 = vmatpush3.bf16.msra.mxu0 %v539_v54  ;;  %v247_v1 = vld [vmem:[%s830_s5 + $0x48] sm:$0xff] }
  0x4a   :  { %541 = vmatprep.subr.bf16.mxu0 %v621_v0  ;;  %v551_v2 = vpack.c.bf16 %v247_v1, %v246_v63 }
  0x4d   :  { %543 = vmatpush3.bf16.msra.mxu0 %v542_v56 }
  0x4e   :  { %544 = vmatprep.subr.bf16.mxu0 %v621_v0 }
  0x51   :  { %546 = vmatpush3.bf16.msra.mxu0 %v545_v59 }
  0x52   :  { %547 = vmatprep.subr.bf16.mxu0 %v621_v0 }
  0x55   :  { %549 = vmatpush3.bf16.msra.mxu0 %v548_v62 }
  0x56   :  { %550 = vmatprep.subr.bf16.mxu0 %v621_v0 }
  0x59   :  { %552 = vmatpush3.bf16.msra.mxu0 %v551_v2 }
  0x5a   :  { %553 = vmatprep.subr.bf16.mxu0 %v621_v0 }
  0x5d   :  { %555 = vmatpush3.bf16.msra.mxu0 %v554_v5 }
  0x5e   :  { %556 = vmatprep.subr.bf16.mxu0 %v621_v0 }
  0x61   :  { %558 = vmatpush3.bf16.msra.mxu0 %v557_v8 }
  0x62   :  { %559 = vmatprep.subr.bf16.mxu0 %v621_v0  ;;  %v333_v0 = vld [vmem:[%s829_s4] ss:$0 sm:$0xff] }
  0x65   :  { %561 = vmatpush3.bf16.msra.mxu0 %v560_v16 }
 0x11b   :  { %v139_v10 = vpop.f32.mrb[0].mxu0 }
 0x11c   :  { %v140_v11 = vadd.f32 %v332_v9, %v139_v10  ;;  %v419_v12 = vpop.f32.mrb[1].mxu0 }
 0x11e   :  { %v143_v13 = vmax.f32 %v140_v11, 0.0 }
 0x120   :  { %453 = vmatmul.mubr.f32.vlgmr.msra.gmra.mrb[0].mxu1 %v143_v13 }
 0x1f3   :  { %v233_v17 = vpop.f32.mrb[0].mxu1 }
 0x1f4   :  { %v234_v18 = vadd.f32 %v333_v0, %v233_v17  ;;  %v454_v19 = vpop.f32.mrb[1].mxu1 }
 0x1f6   :  { %v237_v20 = vmax.f32 %v234_v18, 0.0 }
 0x1f8   :  { %488 = vmatmul.mubr.f32.vlgmr.msra.gmra.mrb[2].mxu0 %v237_v20 }
 0x2cb   :  { %v320_v21 = vpop.f32.mrb[2].mxu0 }
 0x2cc   :  { %325 = vst.msk [vmem:[%s831_s6] sm:$0xff] %vm324_vm1, %v320_v21  ;;  %v489_v22 = vpop.f32.mrb[3].mxu0 }
 0x2cd   :  { %330 = vsyncpa [#allocation3], 1 }
 0x2ce   :  { %331 = vsyncpa [#allocation5], 1 }

</bundles_post_ra>
